<compile_context>
chip_gen: v7x
topology: tpu7x:2x2x1
jax: 0.10.0
libtpu: 0.0.40
codegen_flags: <defaults>
</compile_context>

<pallas_src>
import jax
import jax.numpy as jnp
from jax.experimental import pallas as pl
from jax.experimental.pallas import tpu as pltpu


_GELU_C1 = 0.79788456             # sqrt(2/pi) -- matches Megatron bias_gelu_impl
_GELU_C2 = 0.044715
_GELU_C1C2 = _GELU_C1 * _GELU_C2  # folded constant c1 * c2


def _mlp_kernel(x_ref, w1_ref, b1_ref, w2_ref, o_ref, acc_ref):
    # x_ref:(tm,H)  w1_ref:(H,tf)  b1_ref:(1,tf) f32  w2_ref:(tf,H)
    # o_ref:(tm,H)  acc_ref:(tm,H) f32 scratch carried across the FF (k) axis.
    k = pl.program_id(1)

    @pl.when(k == 0)
    def _():
        acc_ref[...] = jnp.zeros_like(acc_ref)

    x = x_ref[...]
    # matmul-1 with f32 accumulation; the ColumnParallelLinear bias
    # (skip_bias_add=True) is applied here as part of the fused bias-gelu.
    h = jnp.dot(x, w1_ref[...], preferred_element_type=jnp.float32) + b1_ref[...]

    # Megatron fused bias-gelu (tanh approximation):
    #   0.5 * h * (1 + tanh(c1 * h * (1 + c2 * h^2)))
    # rewritten with folded constants so tanh lands on the EUP slot and the
    # per-element VPU multiply count stays minimal.
    u = h * (_GELU_C1 + _GELU_C1C2 * (h * h))
    t = jnp.tanh(u)
    g = 0.5 * h + (0.5 * h) * t

    # matmul-2 partial product over this FF tile, accumulated in f32.
    acc_ref[...] += jnp.dot(g.astype(x.dtype), w2_ref[...],
                            preferred_element_type=jnp.float32)

    @pl.when(k == pl.num_programs(1) - 1)
    def _():
        o_ref[...] = acc_ref[...].astype(o_ref.dtype)


# --------------------------------------------------------------------------- #
# Tiling / VMEM helpers
# --------------------------------------------------------------------------- #
def _round_up(x, m):
    return (x + m - 1) // m * m


def _vmem_capacity_bytes():
    try:
        info = pltpu.get_tpu_info()
        cap = getattr(info, "vmem_capacity_bytes", None)
        if cap:
            return int(cap)
    except Exception:
        pass
    return 64 << 20  # conservative: v7x has the smallest VMEM of current gens


def _choose_tm(M, target):
    """Largest multiple-of-8 divisor of M that is <= target, or M itself when
    M <= target (full-dim block is always legal).  None if no legal tile."""
    if M <= target:
        return M
    t = max(8, (min(target, M) // 8) * 8)
    while t >= 8:
        if M % t == 0:
            return t
        t -= 8
    return None


def _choose_tf(FF, target):
    """Largest multiple-of-128 divisor of FF that is <= target, or FF itself."""
    if FF <= target:
        return FF
    t = max(128, (min(target, FF) // 128) * 128)
    while t >= 128:
        if FF % t == 0:
            return t
        t -= 128
    # TODO(synk): FF larger than target but not a multiple of 128 -- fall back
    # to one huge FF tile; real Megatron FF dims never hit this branch.
    return FF


def _vmem_need(tm, tf, H, c_size, o_size):
    need = 2 * tm * H * c_size          # x block, double-buffered
    need += 2 * H * tf * c_size         # W1 block, double-buffered
    need += 2 * tf * H * c_size         # W2 block, double-buffered
    need += 2 * 8 * max(tf, 128) * 4    # b1 tile (f32, sublane-padded)
    need += 2 * tm * H * o_size         # out block, double-buffered
    need += tm * H * 4                  # f32 accumulator scratch
    need += 2 * tm * tf * 4             # h + elementwise f32 temporaries
    need += tm * tf * c_size            # compute-dtype g copy feeding matmul-2
    need += 4 << 20                     # Mosaic internal scratch margin
    return need


# --------------------------------------------------------------------------- #
# Wrapper
# --------------------------------------------------------------------------- #
def parallel_mlp_forward(hidden_states, w1, b1, w2, b2, *, tm=None, tf=None,
                         vmem_limit_bytes=None):
    """hidden_states: [seq, batch, hidden] (Megatron layout).

    Returns (output [seq, batch, hidden], output_bias) with the dense_4h_to_h
    bias returned separately (skip_bias_add=True), matching ParallelMLP.forward.
    """
    S, B, H = hidden_states.shape
    FF = w1.shape[1]
    M = S * B
    act_dtype = hidden_states.dtype

    # Never upcast the weights (they dominate HBM traffic): compute dtype is
    # the narrower of activation / weight dtype; activations are cast down.
    if jnp.dtype(w1.dtype).itemsize <= jnp.dtype(act_dtype).itemsize:
        compute_dtype = w1.dtype
    else:
        compute_dtype = act_dtype
    c_size = jnp.dtype(compute_dtype).itemsize
    o_size = jnp.dtype(act_dtype).itemsize

    vmem_cap = _vmem_capacity_bytes()
    budget = vmem_cap - (8 << 20)

    # Generation-aware tile targets.  AI ~ tm FLOP/weight-byte vs crossover
    # ~240 (v5e), ~650 (v6e), ~310 (v7x):
    #   128 MiB VMEM chips (v5e/v6e): tm target 1024, tf 512
    #   64  MiB VMEM chips (v7x):     tm target 512,  tf 512
    if tm is None:
        tm = 1024 if vmem_cap >= (100 << 20) else 512
    if tf is None:
        tf = 512

    tm_eff = _choose_tm(M, int(tm))
    pad_rows = 0
    if tm_eff is None:
        # TODO(synk): mask the ragged last M tile in-kernel instead of padding;
        # only reachable when M is large and not a multiple of 8.
        tm_eff = max(8, (int(tm) // 8) * 8)
        pad_rows = _round_up(M, tm_eff) - M
    tf_eff = _choose_tf(FF, int(tf))

    # Guarantee >= 2 M tiles so the grid's "parallel" axis can feed both v7x
    # TensorCores (harmless on 1-TC chips: ~0.35 us extra per grid step).
    while pad_rows == 0 and (M // tm_eff) < 2 and tm_eff > 8:
        smaller = _choose_tm(M, max(8, ((tm_eff // 2) // 8) * 8))
        if smaller is None or smaller >= tm_eff:
            break
        tm_eff = smaller

    # Shrink tiles if the estimated footprint exceeds this chip's VMEM budget:
    # tf first (does not change arithmetic intensity), then tm.
    while _vmem_need(tm_eff, tf_eff, H, c_size, o_size) > budget:
        if tf_eff > 256:
            new_tf = _choose_tf(FF, max(128, tf_eff // 2))
            if new_tf < tf_eff:
                tf_eff = new_tf
                continue
        if tm_eff > 64:
            new_tm = _choose_tm(M + pad_rows, max(8, ((tm_eff // 2) // 8) * 8))
            if new_tm is not None and new_tm < tm_eff:
                tm_eff = new_tm
                continue
        break

    Mp = M + pad_rows
    x2d = hidden_states.reshape(M, H).astype(compute_dtype)
    if pad_rows:
        x2d = jnp.pad(x2d, ((0, pad_rows), (0, 0)))

    w1c = w1.astype(compute_dtype)
    w2c = w2.astype(compute_dtype)
    b1_2d = b1.reshape(1, FF).astype(jnp.float32)   # bias added in f32

    if vmem_limit_bytes is None:
        need = _vmem_need(tm_eff, tf_eff, H, c_size, o_size)
        vmem_limit_bytes = int(min(max(need * 5 // 4, 32 << 20), budget))

    grid = (Mp // tm_eff, FF // tf_eff)

    out2d = pl.pallas_call(
        _mlp_kernel,
        out_shape=jax.ShapeDtypeStruct((Mp, H), act_dtype),
        grid_spec=pltpu.PrefetchScalarGridSpec(
            num_scalar_prefetch=0,
            grid=grid,
            in_specs=[
                pl.BlockSpec((tm_eff, H), lambda i, k: (i, 0)),   # x, resident over k
                pl.BlockSpec((H, tf_eff), lambda i, k: (0, k)),   # W1 FF-tile
                pl.BlockSpec((1, tf_eff), lambda i, k: (0, k)),   # b1 FF-tile (f32)
                pl.BlockSpec((tf_eff, H), lambda i, k: (k, 0)),   # W2 FF-tile
            ],
            out_specs=pl.BlockSpec((tm_eff, H), lambda i, k: (i, 0)),
            scratch_shapes=[pltpu.VMEM((tm_eff, H), jnp.float32)],
        ),
        compiler_params=pltpu.CompilerParams(
            dimension_semantics=("parallel", "arbitrary"),
            vmem_limit_bytes=vmem_limit_bytes,
        ),
    )(x2d, w1c, b1_2d, w2c)

    out2d = out2d[:M] if pad_rows else out2d
    output = out2d.reshape(S, B, H)
    # skip_bias_add=True: bias of dense_4h_to_h is returned, not added.
    # TODO(synk): tensor-model-parallel all-reduce of RowParallelLinear is a
    # no-op here (single model-parallel rank assumed).
    return output, b2


# --------------------------------------------------------------------------- #
# Reference + demo
# --------------------------------------------------------------------------- #
def _reference(hidden_states, w1, b1, w2, b2):
    h = hidden_states @ w1 + b1
    g = 0.5 * h * (1.0 + jnp.tanh(_GELU_C1 * h * (1.0 + _GELU_C2 * h * h)))
    return g @ w2, b2


if __name__ == "__main__":
    # Small shapes consistent with the module: hidden_size=64 -> ff_dim=4*64,
    # Megatron layout [seq, batch, hidden].
    SEQ, BATCH, HIDDEN = 8, 2, 64
    FF = 4 * HIDDEN

    key = jax.random.PRNGKey(0)
    kx, kw1, kb1, kw2, kb2 = jax.random.split(key, 5)

    x = jax.random.normal(kx, (SEQ, BATCH, HIDDEN), dtype=jnp.float32)
    w1 = 0.02 * jax.random.normal(kw1, (HIDDEN, FF), dtype=jnp.float32)
    b1 = 0.02 * jax.random.normal(kb1, (FF,), dtype=jnp.float32)
    w2 = 0.02 * jax.random.normal(kw2, (FF, HIDDEN), dtype=jnp.float32)
    b2 = 0.02 * jax.random.normal(kb2, (HIDDEN,), dtype=jnp.float32)

    # Use full-f32 matmul precision for the f32 numerics checks so kernel and
    # XLA reference use the same MXU path.
    with jax.default_matmul_precision("highest"):
        ref_out, ref_bias = _reference(x, w1, b1, w2, b2)

        # 1) Auto-tuned (generation-aware) tiles.
        out, out_bias = parallel_mlp_forward(x, w1, b1, w2, b2)
        out = jax.block_until_ready(out)
        out_bias = jax.block_until_ready(out_bias)
        assert out.shape == (SEQ, BATCH, HIDDEN)
        assert out.dtype == x.dtype
        assert jnp.allclose(out, ref_out, atol=2e-4, rtol=1e-3)
        assert jnp.allclose(out_bias, ref_bias)

        # 2) Small explicit tiles to exercise the 2-D grid: M split across
        #    tiles + FF-carried accumulation over multiple k steps.
        out2, out_bias2 = parallel_mlp_forward(x, w1, b1, w2, b2, tm=8, tf=128)
        out2 = jax.block_until_ready(out2)
        assert jnp.allclose(out2, ref_out, atol=2e-4, rtol=1e-3)
        assert jnp.allclose(out_bias2, ref_bias)

    # 3) Mixed precision: f32 activations + bf16 weights must NOT upcast the
    #    weights -- bf16 MXU path with f32 accumulation, f32 output.
    out3, _ = parallel_mlp_forward(x, w1.astype(jnp.bfloat16), b1,
                                   w2.astype(jnp.bfloat16), b2)
    out3 = jax.block_until_ready(out3)
    assert out3.dtype == x.dtype
    assert jnp.allclose(out3, ref_out, atol=1e-2, rtol=5e-2)

    print("KERNEL_OK")
</pallas_src>

<mosaic_0001>
module attributes {stable_mosaic.version = 11 : i64} {
  func.func @_mlp_kernel(%arg0: i32, %arg1: i32, %arg2: memref<8x64xf32, #tpu.memory_space<vmem>>, %arg3: memref<64x256xf32, #tpu.memory_space<vmem>>, %arg4: memref<1x256xf32, #tpu.memory_space<vmem>>, %arg5: memref<256x64xf32, #tpu.memory_space<vmem>>, %arg6: memref<8x64xf32, #tpu.memory_space<vmem>>, %arg7: memref<8x64xf32, #tpu.memory_space<vmem>>) attributes {dimension_semantics = [#tpu.dimension_semantics<parallel>, #tpu.dimension_semantics<arbitrary>], iteration_bounds = array<i64: 2, 1>, scalar_prefetch = 0 : i64, scratch_operands = 1 : i64, tpu.core_type = #tpu.core_type<tc>, window_params = [{transform_indices = @transform_0, window_bounds = array<i64: 8, 64>}, {transform_indices = @transform_1, window_bounds = array<i64: 64, 256>}, {transform_indices = @transform_2, window_bounds = array<i64: 1, 256>}, {transform_indices = @transform_3, window_bounds = array<i64: 256, 64>}, {transform_indices = @transform_4, window_bounds = array<i64: 8, 64>}]} {
    %c0_i32 = arith.constant 0 : i32
    %0 = arith.cmpi eq, %arg1, %c0_i32 : i32
    %1 = arith.extui %0 : i1 to i32
    %c0_i32_0 = arith.constant 0 : i32
    %2 = arith.cmpi ne, %1, %c0_i32_0 : i32
    scf.if %2 {
      %cst_19 = arith.constant 0.000000e+00 : f32
      %30 = vector.broadcast %cst_19 : f32 to vector<8x64xf32>
      %c0_20 = arith.constant 0 : index
      %c0_21 = arith.constant 0 : index
      %31 = vector.load %arg7[%c0_20, %c0_21] : memref<8x64xf32, #tpu.memory_space<vmem>>, vector<8x64xf32>
      tpu.vector_store %arg7[%c0_20, %c0_21], %30 {strides = array<i32>} : memref<8x64xf32, #tpu.memory_space<vmem>>, vector<8x64xf32>,
    } else {
    }
    %c0 = arith.constant 0 : index
    %c0_1 = arith.constant 0 : index
    %3 = vector.load %arg2[%c0, %c0_1] : memref<8x64xf32, #tpu.memory_space<vmem>>, vector<8x64xf32>
    %c0_2 = arith.constant 0 : index
    %c0_3 = arith.constant 0 : index
    %4 = vector.load %arg3[%c0_2, %c0_3] : memref<64x256xf32, #tpu.memory_space<vmem>>, vector<64x256xf32>
    %cst = arith.constant dense<0.000000e+00> : vector<8x256xf32>
    %5 = tpu.matmul %3, %4, %cst {dimension_numbers = #tpu.dot_dimension_numbers<[1], [0], [0], [1], [0, 0, 1, 1], [], []>, precision = #tpu.contract_precision<fp32>} : vector<8x64xf32>, vector<64x256xf32>, vector<8x256xf32> -> vector<8x256xf32>
    %c0_4 = arith.constant 0 : index
    %c0_5 = arith.constant 0 : index
    %6 = vector.load %arg4[%c0_4, %c0_5] : memref<1x256xf32, #tpu.memory_space<vmem>>, vector<1x256xf32>
    %7 = vector.broadcast %6 : vector<1x256xf32> to vector<8x256xf32>
    %8 = arith.addf %5, %7 : vector<8x256xf32>
    %9 = arith.mulf %8, %8 : vector<8x256xf32>
    %cst_6 = arith.constant 0.0356774069 : f32
    %10 = vector.broadcast %cst_6 : f32 to vector<8x256xf32>
    %11 = arith.mulf %10, %9 : vector<8x256xf32>
    %cst_7 = arith.constant 0.797884583 : f32
    %12 = vector.broadcast %cst_7 : f32 to vector<8x256xf32>
    %13 = arith.addf %12, %11 : vector<8x256xf32>
    %14 = arith.mulf %8, %13 : vector<8x256xf32>
    %15 = math.tanh %14 : vector<8x256xf32>
    %cst_8 = arith.constant 5.000000e-01 : f32
    %16 = vector.broadcast %cst_8 : f32 to vector<8x256xf32>
    %17 = arith.mulf %16, %8 : vector<8x256xf32>
    %cst_9 = arith.constant 5.000000e-01 : f32
    %18 = vector.broadcast %cst_9 : f32 to vector<8x256xf32>
    %19 = arith.mulf %18, %8 : vector<8x256xf32>
    %20 = arith.mulf %19, %15 : vector<8x256xf32>
    %21 = arith.addf %17, %20 : vector<8x256xf32>
    %c0_10 = arith.constant 0 : index
    %c0_11 = arith.constant 0 : index
    %22 = vector.load %arg7[%c0_10, %c0_11] : memref<8x64xf32, #tpu.memory_space<vmem>>, vector<8x64xf32>
    %c0_12 = arith.constant 0 : index
    %c0_13 = arith.constant 0 : index
    %23 = vector.load %arg5[%c0_12, %c0_13] : memref<256x64xf32, #tpu.memory_space<vmem>>, vector<256x64xf32>
    %cst_14 = arith.constant dense<0.000000e+00> : vector<8x64xf32>
    %24 = tpu.matmul %21, %23, %cst_14 {dimension_numbers = #tpu.dot_dimension_numbers<[1], [0], [0], [1], [0, 0, 1, 1], [], []>, precision = #tpu.contract_precision<fp32>} : vector<8x256xf32>, vector<256x64xf32>, vector<8x64xf32> -> vector<8x64xf32>
    %25 = arith.addf %22, %24 : vector<8x64xf32>
    %c0_15 = arith.constant 0 : index
    %c0_16 = arith.constant 0 : index
    %26 = vector.load %arg7[%c0_15, %c0_16] : memref<8x64xf32, #tpu.memory_space<vmem>>, vector<8x64xf32>
    tpu.vector_store %arg7[%c0_15, %c0_16], %25 {strides = array<i32>} : memref<8x64xf32, #tpu.memory_space<vmem>>, vector<8x64xf32>,
    %c0_i32_17 = arith.constant 0 : i32
    %27 = arith.cmpi eq, %arg1, %c0_i32_17 : i32
    %28 = arith.extui %27 : i1 to i32
    %c0_i32_18 = arith.constant 0 : i32
    %29 = arith.cmpi ne, %28, %c0_i32_18 : i32
    scf.if %29 {
      %c0_19 = arith.constant 0 : index
      %c0_20 = arith.constant 0 : index
      %30 = vector.load %arg7[%c0_19, %c0_20] : memref<8x64xf32, #tpu.memory_space<vmem>>, vector<8x64xf32>
      %c0_21 = arith.constant 0 : index
      %c0_22 = arith.constant 0 : index
      %31 = vector.load %arg6[%c0_21, %c0_22] : memref<8x64xf32, #tpu.memory_space<vmem>>, vector<8x64xf32>
      tpu.vector_store %arg6[%c0_21, %c0_22], %30 {strides = array<i32>} : memref<8x64xf32, #tpu.memory_space<vmem>>, vector<8x64xf32>,
    } else {
    }
    return
  }
  func.func @transform_0(%arg0: i32, %arg1: i32) -> (i32, i32) {
    %c0_i32 = arith.constant 0 : i32
    %c0_i32_0 = arith.constant 0 : i32
    return %arg0, %c0_i32 : i32, i32
  }
  func.func @transform_1(%arg0: i32, %arg1: i32) -> (i32, i32) {
    %c0_i32 = arith.constant 0 : i32
    %c0_i32_0 = arith.constant 0 : i32
    return %c0_i32, %arg1 : i32, i32
  }
  func.func @transform_2(%arg0: i32, %arg1: i32) -> (i32, i32) {
    %c0_i32 = arith.constant 0 : i32
    %c0_i32_0 = arith.constant 0 : i32
    return %c0_i32, %arg1 : i32, i32
  }
  func.func @transform_3(%arg0: i32, %arg1: i32) -> (i32, i32) {
    %c0_i32 = arith.constant 0 : i32
    %c0_i32_0 = arith.constant 0 : i32
    return %arg1, %c0_i32 : i32, i32
  }
  func.func @transform_4(%arg0: i32, %arg1: i32) -> (i32, i32) {
    %c0_i32 = arith.constant 0 : i32
    %c0_i32_0 = arith.constant 0 : i32
    return %arg0, %c0_i32 : i32, i32
  }
}

</mosaic_0001>

<bundles_post_ra>
// kernel: tpu_custom_call.1
= control target key start
LH: loop header
LB: loop body
LE: loop exit
PB: predicated region body
PF: predicated region fallthrough
CT: control target
= control target key end

     0   :  { %9 = vsyncpa [#allocation4], 0  ;;  %s3915_s0 = inlined_call_operand.vmem [shape: f32[16,64], index: 0, kind: input, shape index: {}]   ;;  %s3916_s1 = inlined_call_operand.vmem [shape: f32[64,256], index: 1, kind: input, shape index: {}]   ;;  %s3917_s2 = inlined_call_operand.vmem [shape: f32[1,256], index: 2, kind: input, shape index: {}]   ;;  %s3918_s3 = inlined_call_operand.vmem [shape: f32[256,64], index: 3, kind: input, shape index: {}]   ;;  %s3919_s4 = inlined_call_operand.hbm [shape: f32[16,64], index: 4, kind: output, shape index: {}]  }
   0x1   :  { %11 = vsyncpa [#allocation4 + $0x1], 0  ;;  %s2686_s15 = smov 0   ;;  %s2688_s16 = smov 0  }
   0x2   :  { %s2690_s17 = smov 0   ;;  %s2692_s18 = smov 0  }
   0x3   :  { %s2694_s19 = smov 0   ;;  %s2696_s20 = smov 0  }
   0x4 LB: > { %s1995_s21 = sadd.s32 4294967295, %s2657_s20   ;;  %s1996_s22 = sadd.s32 4294967294, %s2657_s20   ;;  %s2657_s20 = sphi %s2696_s20, %s17_s20   ;;  %s2653_s19 = sphi %s2694_s19, %s4155_s19   ;;  %s2649_s18 = sphi %s2692_s18, %s4154_s18   ;;  %s2645_s17 = sphi %s2690_s17, %s4153_s17   ;;  %s2641_s16 = sphi %s2688_s16, %s4152_s16   ;;  %s2637_s15 = sphi %s2686_s15, %s4151_s15  }
   0x5   : > { %s29_s23 = sadd.s32 1, %s2653_s19  ;;  %s140_s24 = sadd.s32 1, %s2645_s17 }
   0x6   : > { %p31_p0 = scmp.ge.s32.totalorder %s29_s23, 2  ;;  %p150_p1 = scmp.ne.s32.totalorder %s2645_s17, %s2641_s16 }
   0x7   : > { %p151_p2 = scmp.eq.s32.totalorder %s1995_s21, 1  ;;  %p156_p3 = scmp.ne.s32.totalorder %s2641_s16, %s2637_s15 }
   0x8   : > { %s4157_s23 = smov (%p31_p0, %s29_s23), 0  ;;  %p157_p5 = scmp.eq.s32.totalorder %s1996_s22, 1 }
   0x9   : > { %p2726_p4 = por %p151_p2, %p150_p1  ;;  %s137_s26 = ssub.s32 %s2653_s19, %s4157_s23 }
   0xa   : > { %p2002_p6 = scmp.ge.s32.totalorder %s2657_s20, 1  ;;  %p138_p7 = scmp.eq.s32.totalorder %s137_s26, 0 }
   0xb   : > { %p2733_p8 = por %p157_p5, %p156_p3  ;;  %p208_p9 = scmp.lt.s32.totalorder %s2657_s20, 3 }
   0xc   : > { %s2739_s28 = scalar_select %p138_p7, %s2645_s17, %s140_s24  }
   0xd   : > { %p209_p10 = pnand %p2002_p6, %p208_p9 }
   0xf   : > { %212 = sbr.rel (%p209_p10) target bundleno = 706 (0x2c2), region = 36 }
  0x16   : > { %v2744_v0 = vld [vmem:[%s3916_s1 + $0x8] sm:$0xff]  ;;  %v2749_v1 = vld [vmem:[%s3916_s1 + $0x18] sm:$0xff]  ;;  %v2754_v2 = vld [vmem:[%s3916_s1] sm:$0xff]  ;;  %vm272_vm0 = vcmask 523264   ;;  %v2659_v9 = vmov 0.0   ;;  %p247_p11 = scmp.lt.s32.totalorder %s2649_s18, 1 }
  0x17   : > { %v307_v3 = vand.u32 4294901760, %v2744_v0  ;;  %v311_v4 = vand.u32 4294901760, %v2749_v1  ;;  %v2761_v5 = vld [vmem:[%s3916_s1 + $0x10] sm:$0xff]  ;;  %v309_v6 = vand.u32 4294901760, %v2754_v2  ;;  %v2767_v7 = vld [vmem:[%s3916_s1 + $0x28] sm:$0xff]  ;;  %v2772_v8 = vld [vmem:[%s3916_s1 + $0x38] sm:$0xff]  ;;  %543 = vmatprep.mubr.f32.mxu0 %v2659_v9  ;;  %387 = vmatprep.mubr.f32.mxu1 %v2659_v9 }
  0x18   : > { %273 = vst.msk [vmem:[#allocation2] sm:$0xff] %vm272_vm0, %v2659_v9  ;;  %v313_v10 = vand.u32 4294901760, %v2761_v5  ;;  %v315_v11 = vand.u32 4294901760, %v2767_v7  ;;  %v319_v12 = vand.u32 4294901760, %v2772_v8  ;;  %v2784_v13 = vld [vmem:[%s3916_s1 + $0x20] sm:$0xff]  ;;  %v2789_v14 = vld [vmem:[%s3916_s1 + $0x30] sm:$0xff] }
  0x19   : > { %v2794_v15 = vsub.f32 %v2744_v0, %v307_v3  ;;  %v2799_v16 = vsub.f32 %v2749_v1, %v311_v4  ;;  %v2804_v17 = vsub.f32 %v2754_v2, %v309_v6  ;;  %v317_v18 = vand.u32 4294901760, %v2784_v13  ;;  %v2862_v39 = vld [vmem:[%s3916_s1 + $0x48] sm:$0xff]  ;;  %v2867_v40 = vld [vmem:[%s3916_s1 + $0x58] sm:$0xff]  ;;  %v2876_v45 = vld [vmem:[%s3916_s1 + $0x40] sm:$0xff]  ;;  %s2907_s24 = scalar_select %p247_p11, %s2649_s18, 1 }
  0x1a   : > { %v2810_v19 = vsub.f32 %v2761_v5, %v313_v10  ;;  %v2815_v20 = vsub.f32 %v2767_v7, %v315_v11  ;;  %v2820_v21 = vsub.f32 %v2772_v8, %v319_v12  ;;  %v321_v22 = vand.u32 4294901760, %v2789_v14  ;;  %v2884_v50 = vld [vmem:[%s3916_s1 + $0x50] sm:$0xff]  ;;  %v2889_v51 = vld [vmem:[%s3916_s1 + $0x68] sm:$0xff]  ;;  %v2896_v56 = vld [vmem:[%s3916_s1 + $0x78] sm:$0xff]  ;;  %s244_s10 = sand.u32 1, %s2641_s16   ;;  %s2006_s12 = sshll.u32 %s2649_s18, 7 }
  0x1b   : > { %v3931_v23 = vand.u32 4294901760, %v2794_v15  ;;  %v3930_v24 = vand.u32 4294901760, %v2799_v16  ;;  %v3928_v25 = vand.u32 4294901760, %v2804_v17  ;;  %v2829_v26 = vsub.f32 %v2784_v13, %v317_v18  ;;  %v2901_v57 = vld [vmem:[%s3916_s1 + $0x60] sm:$0xff]  ;;  %s2004_s30 = sshll.u32 %s2907_s24, 3  ;;  %s2003_s11 = sshll.u32 %s244_s10, 3 }
  0x1c   : > { %v3926_v27 = vand.u32 4294901760, %v2810_v19  ;;  %v3924_v28 = vand.u32 4294901760, %v2815_v20  ;;  %v3922_v29 = vand.u32 4294901760, %v2820_v21  ;;  %v2837_v30 = vsub.f32 %v2789_v14, %v321_v22  ;;  %s250_s7 = scalar_lea.vmem %s3915_s0, %s2004_s30  ;;  %s246_s13 = scalar_lea.vmem [#allocation3], %s2003_s11 }
  0x1d   : > { %v402_v31 = vsub.f32 %v2794_v15, %v3931_v23  ;;  %v414_v32 = vsub.f32 %v2799_v16, %v3930_v24  ;;  %v408_v33 = vsub.f32 %v2804_v17, %v3928_v25  ;;  %v3921_v34 = vand.u32 4294901760, %v2829_v26  ;;  %s1886_s14 = sshll.u32 %s246_s13, 4  ;;  %s3867_s24 = scalar_lea.hbm %s3919_s4, %s2006_s12  ;;  %s3869_s14 = int_to_ptr.vmem [resolvable:$true] %s1886_s14 }
  0x1e   : > { %v420_v35 = vsub.f32 %v2810_v19, %v3926_v27  ;;  %v426_v36 = vsub.f32 %v2815_v20, %v3924_v28  ;;  %v438_v37 = vsub.f32 %v2820_v21, %v3922_v29  ;;  %v3920_v38 = vand.u32 4294901760, %v2837_v30  ;;  %s1873_s26 = scalar_lea.sflag [#allocation4], %s244_s10  ;;  %s2579_s29 = scalar_lea.vmem %s3869_s14, 128 }
  0x1f   : > { %v403_v41 = vand.u32 4294901760, %v402_v31  ;;  %v415_v42 = vand.u32 4294901760, %v414_v32  ;;  %v409_v43 = vand.u32 4294901760, %v408_v33  ;;  %v432_v44 = vsub.f32 %v2829_v26, %v3921_v34  ;;  %v2924_v33 = vld [vmem:[%s3916_s1 + $0x70] sm:$0xff]  ;;  %p2580_p12 = scmp.ne.s32.totalorder %s3869_s14, %s2579_s29  ;;  %s2660_s18 = smov [#allocation3]  }
  0x20   : > { %v421_v46 = vand.u32 4294901760, %v420_v35  ;;  %v427_v47 = vand.u32 4294901760, %v426_v36  ;;  %v439_v48 = vand.u32 4294901760, %v438_v37  ;;  %v444_v49 = vsub.f32 %v2837_v30, %v3920_v38  ;;  %s2583_s30 = sshll.u32 %s2660_s18, 4  ;;  %s2584_s30 = int_to_ptr.vmem [resolvable:$false] %s2583_s30 }
  0x21   : > { %v2235_v52 = vpack.c.bf16 %v415_v42, %v403_v41  ;;  %v433_v53 = vand.u32 4294901760, %v432_v44  ;;  %v323_v54 = vand.u32 4294901760, %v2862_v39  ;;  %v327_v55 = vand.u32 4294901760, %v2867_v40  ;;  %p2581_p13 = pnand %p2580_p12, %p2726_p4  ;;  %s2585_s5 = scalar_lea.vmem %s2584_s30, 256 }
  0x22   : > { %v2237_v58 = vpack.c.bf16 %v421_v46, %v409_v43  ;;  %v2239_v59 = vpack.c.bf16 %v439_v48, %v427_v47  ;;  %v445_v60 = vand.u32 4294901760, %v444_v49  ;;  %v325_v61 = vand.u32 4294901760, %v2876_v45  ;;  %p2586_p1 = scmp.lt.s32.totalorder %s3869_s14, %s2584_s30  ;;  %p2587_p2 = scmp.lt.s32.totalorder %s2585_s5, %s2579_s29 }
  0x23   : > { %2236 = vmatprep.subr.bf16.mxu0 %v2235_v52  ;;  %v2912_v62 = vsub.f32 %v2862_v39, %v323_v54  ;;  %v2917_v63 = vsub.f32 %v2867_v40, %v327_v55  ;;  %v3938_v31 = vand.u32 4294901760, %v2884_v50  ;;  %v3936_v32 = vand.u32 4294901760, %v2889_v51  ;;  %p2582_p0 = pneg %p2581_p13 }
  0x24   : > { %2238 = vmatpush1.bf16.msra.mxu0 %v2237_v58  ;;  %v2241_v35 = vpack.c.bf16 %v445_v60, %v433_v53  ;;  %v2929_v36 = vsub.f32 %v2876_v45, %v325_v61  ;;  %v3935_v37 = vand.u32 4294901760, %v2896_v56  ;;  %v3934_v41 = vand.u32 4294901760, %v2901_v57  ;;  %p2588_p3 = por %p2587_p2, %p2586_p1 }
  0x25   : > { %2240 = vmatprep.subr.bf16.mxu0 %v2239_v59  ;;  %v3923_v42 = vand.u32 4294901760, %v2912_v62  ;;  %v3925_v43 = vand.u32 4294901760, %v2917_v63  ;;  %v2938_v44 = vsub.f32 %v2884_v50, %v3938_v31  ;;  %v2943_v46 = vsub.f32 %v2889_v51, %v3936_v32 }
  0x26   : > { %v3927_v47 = vand.u32 4294901760, %v2929_v36  ;;  %v2949_v48 = vsub.f32 %v2896_v56, %v3935_v37  ;;  %v3932_v49 = vand.u32 4294901760, %v2924_v33  ;;  %v2955_v52 = vsub.f32 %v2901_v57, %v3934_v41  ;;  %p2589_p5 = pnand %p2588_p3, %p2582_p0 }
  0x27   : > { %v450_v53 = vsub.f32 %v2912_v62, %v3923_v42  ;;  %v462_v58 = vsub.f32 %v2917_v63, %v3925_v43  ;;  %v3929_v59 = vand.u32 4294901760, %v2938_v44  ;;  %v3933_v60 = vand.u32 4294901760, %v2943_v46 }
  0x28   : > { %2242 = vmatpush1.bf16.msra.mxu0 %v2241_v35  ;;  %v456_v38 = vsub.f32 %v2929_v36, %v3927_v47  ;;  %v3937_v34 = vand.u32 4294901760, %v2949_v48  ;;  %v479_v29 = vand.u32 4294901760, %v2955_v52  ;;  %v2974_v42 = vsub.f32 %v2924_v33, %v3932_v49 }
  0x29   : > { %v451_v28 = vand.u32 4294901760, %v450_v53  ;;  %v463_v43 = vand.u32 4294901760, %v462_v58  ;;  %v468_v27 = vsub.f32 %v2938_v44, %v3929_v59  ;;  %v474_v35 = vsub.f32 %v2943_v46, %v3933_v60 }
  0x2a   : > { %v457_v47 = vand.u32 4294901760, %v456_v38  ;;  %v486_v25 = vsub.f32 %v2949_v48, %v3937_v34  ;;  %v480_v53 = vsub.f32 %v2955_v52, %v479_v29  ;;  %v491_v58 = vand.u32 4294901760, %v2974_v42  ;;  %v274_v38 = vld [vmem:[%s250_s7] sm:$0xff] }
  0x2b   : > { %v2243_v59 = vpack.c.bf16 %v463_v43, %v451_v28  ;;  %v469_v24 = vand.u32 4294901760, %v468_v27  ;;  %v475_v23 = vand.u32 4294901760, %v474_v35  ;;  %v305_v31 = vsel %vm272_vm0, %v274_v38, 0  ;;  %v3145_v35 = vld [vmem:[%s3918_s3 + $0x98] sm:$0xff]  ;;  %v3154_v38 = vld [vmem:[%s3918_s3 + $0x10] sm:$0xff] }
  0x2c   : > { %v487_v49 = vand.u32 4294901760, %v486_v25  ;;  %v481_v60 = vand.u32 4294901760, %v480_v53  ;;  %v492_v41 = vsub.f32 %v2974_v42, %v491_v58  ;;  %v3000_v27 = vpack.c.bf16 %v311_v4, %v307_v3 }
  0x2d   : > { %2244 = vmatprep.subr.bf16.mxu0 %v2243_v59  ;;  %v2245_v37 = vpack.c.bf16 %v469_v24, %v457_v47  ;;  %v2251_v28 = vpack.c.bf16 %v2799_v16, %v2794_v15  ;;  %v3011_v24 = vand.u32 4294901760, %v305_v31  ;;  %v3017_v0 = vpack.c.bf16 %v319_v12, %v315_v11 }
  0x2e   : > { %v2247_v32 = vpack.c.bf16 %v487_v49, %v475_v23  ;;  %v493_v34 = vand.u32 4294901760, %v492_v41  ;;  %v3008_v23 = vpack.c.bf16 %v313_v10, %v309_v6  ;;  %2220 = vmatprep.subr.bf16.mxu1 %v3000_v27  ;;  %v2253_v1 = vpack.c.bf16 %v2810_v19, %v2804_v17 }
  0x2f   : > { %2246 = vmatpush1.bf16.msra.mxu0 %v2245_v37  ;;  %v2255_v2 = vpack.c.bf16 %v2820_v21, %v2815_v20  ;;  %v2225_v3 = vpack.c.bf16 %v321_v22, %v317_v18  ;;  %v389_v4 = vsub.f32 %v305_v31, %v3011_v24  ;;  %v2227_v5 = vpack.c.bf16 %v327_v55, %v323_v54 }
  0x30   : > { %2248 = vmatprep.subr.bf16.mxu0 %v2247_v32  ;;  %v2249_v25 = vpack.c.bf16 %v493_v34, %v481_v60  ;;  %2222 = vmatpush1.bf16.msra.mxu1 %v3008_v23  ;;  %v2257_v6 = vpack.c.bf16 %v2837_v30, %v2829_v26  ;;  %v2259_v8 = vpack.c.bf16 %v2917_v63, %v2912_v62  ;;  %v4015_v10 = vand.u32 4294901760, %v2884_v50  ;;  %v3140_v60 = vld [vmem:[%s3918_s3 + $0x90] sm:$0xff] }
  0x31   : > { %2224 = vmatprep.subr.bf16.mxu1 %v3017_v0  ;;  %v390_v7 = vand.u32 4294901760, %v389_v4  ;;  %v4016_v12 = vand.u32 4294901760, %v2889_v51  ;;  %v4017_v13 = vand.u32 4294901760, %v2896_v56  ;;  %v2261_v22 = vpack.c.bf16 %v2938_v44, %v2929_v36 }
  0x32   : > { %v2229_v11 = vpack.c.bf16 %v4015_v10, %v325_v61  ;;  %v2263_v34 = vpack.c.bf16 %v2949_v48, %v2943_v46  ;;  %v4018_v39 = vand.u32 4294901760, %v2901_v57  ;;  %v4019_v40 = vand.u32 4294901760, %v2924_v33 }
  0x33   : > { %2250 = vmatpush1.bf16.msra.mxu0 %v2249_v25  ;;  %v2231_v14 = vpack.c.bf16 %v4017_v13, %v4016_v12  ;;  %v391_v18 = vsub.f32 %v389_v4, %v390_v7  ;;  %v2265_v51 = vpack.c.bf16 %v2974_v42, %v2955_v52  ;;  %v4020_v54 = vand.u32 4294901760, %v2794_v15  ;;  %v3116_v42 = vld [vmem:[%s3918_s3] sm:$0xff]  ;;  %v3225_v12 = vld [vmem:[%s3918_s3 + $0xb8] sm:$0xff] }
  0x34   : > { %2252 = vmatprep.subr.bf16.mxu0 %v2251_v28  ;;  %2226 = vmatpush1.bf16.msra.mxu1 %v2225_v3  ;;  %v2233_v45 = vpack.c.bf16 %v4019_v40, %v4018_v39  ;;  %v4021_v55 = vand.u32 4294901760, %v2799_v16  ;;  %v4022_v57 = vand.u32 4294901760, %v2804_v17  ;;  %v4023_v61 = vand.u32 4294901760, %v2810_v19 }
  0x35   : > { %2228 = vmatprep.subr.bf16.mxu1 %v2227_v5  ;;  %v392_v50 = vand.u32 4294901760, %v391_v18  ;;  %v4024_v32 = vand.u32 4294901760, %v2815_v20  ;;  %v4025_v33 = vand.u32 4294901760, %v2820_v21  ;;  %v4026_v41 = vand.u32 4294901760, %v2829_v26  ;;  %v3234_v18 = vld [vmem:[%s3918_s3 + $0x30] sm:$0xff] }
  0x36   : > { %545 = vmatmul.mubr.f32.vlgmr.msra.gmra.mrb[0].mxu0 %v3011_v24  ;;  %v2283_v56 = vpack.c.bf16 %v4021_v55, %v4020_v54  ;;  %v2285_v31 = vpack.c.bf16 %v4023_v61, %v4022_v57  ;;  %v4027_v15 = vand.u32 4294901760, %v2837_v30  ;;  %v4028_v17 = vand.u32 4294901760, %v2912_v62  ;;  %v3279_v57 = vld [vmem:[%s3918_s3 + $0x48] sm:$0xff] }
  0x37   : > { %2254 = vmatpush1.bf16.msra.mxu0 %v2253_v1  ;;  %647 = vmatprep.mubr.f32.mxu0 %v2659_v9  ;;  %v2287_v37 = vpack.c.bf16 %v4025_v33, %v4024_v32  ;;  %v4029_v19 = vand.u32 4294901760, %v2917_v63  ;;  %v4030_v20 = vand.u32 4294901760, %v2929_v36  ;;  %v4031_v21 = vand.u32 4294901760, %v2938_v44  ;;  %v3109_v63 = vld [vmem:[%s3918_s3 + $0x88] sm:$0xff] }
  0x38   : > { %2256 = vmatprep.subr.bf16.mxu0 %v2255_v2  ;;  %2230 = vmatpush1.bf16.msra.mxu1 %v2229_v11  ;;  %v2289_v16 = vpack.c.bf16 %v4027_v15, %v4026_v41  ;;  %v4032_v26 = vand.u32 4294901760, %v2943_v46  ;;  %v4033_v30 = vand.u32 4294901760, %v2949_v48  ;;  %v2297_v62 = vpack.c.bf16 %v491_v58, %v479_v29  ;;  %v3104_v29 = vld [vmem:[%s3918_s3 + $0x80] sm:$0xff]  ;;  %v3121_v44 = vld [vmem:[%s3918_s3 + $0x8] sm:$0xff]  ;;  %v3305_v41 = vld [vmem:[%s3918_s3 + $0xd8] sm:$0xff] }
  0x39   : > { %2232 = vmatprep.subr.bf16.mxu1 %v2231_v14  ;;  %v2291_v43 = vpack.c.bf16 %v4029_v19, %v4028_v17  ;;  %v2293_v47 = vpack.c.bf16 %v4031_v21, %v4030_v20  ;;  %v1055_v36 = vand.u32 4294901760, %v3109_v63  ;;  %v1004_v46 = vand.u32 4294901760, %v3116_v42  ;;  %v3185_v1 = vld [vmem:[%s3918_s3 + $0xa8] sm:$0xff]  ;;  %v981_v17 = vld [vmem:[%s3918_s3 + $0x50] sm:$0xff]  ;;  %v982_v19 = vld [vmem:[%s3918_s3 + $0x58] sm:$0xff] }
  0x3a   : > { %v2295_v49 = vpack.c.bf16 %v4033_v30, %v4032_v26  ;;  %v3955_v48 = vand.u32 4294901760, %v3121_v44  ;;  %v3954_v53 = vand.u32 4294901760, %v3140_v60  ;;  %v3953_v58 = vand.u32 4294901760, %v3145_v35  ;;  %v999_v26 = vld [vmem:[%s3918_s3 + $0xe0] sm:$0xff]  ;;  %v1000_v30 = vld [vmem:[%s3918_s3 + $0xe8] sm:$0xff] }
  0x3b   : > { %2258 = vmatpush1.bf16.msra.mxu0 %v2257_v6  ;;  %v3952_v25 = vand.u32 4294901760, %v3154_v38  ;;  %v1037_v20 = vand.u32 4294901760, %v982_v19 }
  0x3c   : > { %2260 = vmatprep.subr.bf16.mxu0 %v2259_v8  ;;  %2234 = vmatpush1.bf16.msra.mxu1 %v2233_v45  ;;  %v3135_v59 = vpack.c.bf16 %v3955_v48, %v1004_v46 }
  0x3f   : > { %2262 = vmatpush1.bf16.msra.mxu0 %v2261_v22  ;;  %393 = vmatmul.mubr.f32.vlgmr.msra.gmra.mrb[0].mxu1 %v392_v50  ;;  %v3239_v22 = vld [vmem:[%s3918_s3 + $0x38] sm:$0xff]  ;;  %v3260_v50 = vld [vmem:[%s3918_s3 + $0xc0] sm:$0xff] }
  0x40   : > { %2264 = vmatprep.subr.bf16.mxu0 %v2263_v34  ;;  %v3944_v34 = vand.u32 4294901760, %v3234_v18  ;;  %v3943_v39 = vand.u32 4294901760, %v3239_v22  ;;  %v3942_v54 = vand.u32 4294901760, %v3260_v50 }
  0x43   : > { %2266 = vmatpush1.bf16.msra.mxu0 %v2265_v51  ;;  %v3265_v51 = vld [vmem:[%s3918_s3 + $0xc8] sm:$0xff] }
  0x44   : > { %2268 = vmatprep.subr.bf16.mxu0 %v3000_v27  ;;  %v3941_v55 = vand.u32 4294901760, %v3265_v51 }
  0x46   : > { %650 = vmatmul.mubr.f32.vlgmr.msra.gmra.mrb[0].mxu0 %v389_v4  ;;  %v3194_v4 = vld [vmem:[%s3918_s3 + $0x20] sm:$0xff]  ;;  %v3289_v32 = vpack.c.bf16 %v3941_v55, %v3942_v54 }
  0x47   : > { %2270 = vmatpush1.bf16.msra.mxu0 %v3008_v23  ;;  %736 = vmatprep.mubr.f32.mxu0 %v2659_v9  ;;  %v3948_v6 = vand.u32 4294901760, %v3194_v4 }
  0x48   : > { %2272 = vmatprep.subr.bf16.mxu0 %v3017_v0 }
  0x4b   : > { %2274 = vmatpush1.bf16.msra.mxu0 %v2225_v3 }
  0x4c   : > { %2276 = vmatprep.subr.bf16.mxu0 %v2227_v5 }
  0x4f   : > { %2278 = vmatpush1.bf16.msra.mxu0 %v2229_v11 }
  0x50   : > { %2280 = vmatprep.subr.bf16.mxu0 %v2231_v14 }
  0x53   : > { %2282 = vmatpush1.bf16.msra.mxu0 %v2233_v45 }
  0x54   : > { %2284 = vmatprep.subr.bf16.mxu0 %v2283_v56  ;;  %v3274_v56 = vld [vmem:[%s3918_s3 + $0x40] sm:$0xff] }
  0x55   : > { %v3940_v61 = vand.u32 4294901760, %v3274_v56 }
  0x56   : > { %740 = vmatmul.mubr.f32.vlgmr.msra.gmra.mrb[0].mxu0 %v390_v7 }
  0x57   : > { %2286 = vmatpush1.bf16.msra.mxu0 %v2285_v31  ;;  %858 = vmatprep.mubr.f32.mxu0 %v2659_v9  ;;  %v3939_v31 = vand.u32 4294901760, %v3279_v57 }
  0x58   : > { %2288 = vmatprep.subr.bf16.mxu0 %v2287_v37  ;;  %v3300_v37 = vld [vmem:[%s3918_s3 + $0xd0] sm:$0xff] }
  0x59   : > { %v3295_v33 = vpack.c.bf16 %v3939_v31, %v3940_v61  ;;  %v1082_v15 = vand.u32 4294901760, %v3300_v37  ;;  %v983_v31 = vld [vmem:[%s3918_s3 + $0x60] sm:$0xff]  ;;  %v984_v61 = vld [vmem:[%s3918_s3 + $0x68] sm:$0xff] }
  0x5a   : > { %v1040_v55 = vand.u32 4294901760, %v983_v31  ;;  %v1043_v54 = vand.u32 4294901760, %v984_v61 }
  0x5b   : > { %2290 = vmatpush1.bf16.msra.mxu0 %v2289_v16  ;;  %4034 = vst [vmem:[#allocation6_spill] sm:$0xff] %v3295_v33  ;;  %v1085_v16 = vand.u32 4294901760, %v3305_v41 }
  0x5c   : > { %2292 = vmatprep.subr.bf16.mxu0 %v2291_v43  ;;  %v1034_v43 = vand.u32 4294901760, %v981_v17 }
  0x5d   : > { %v3319_v21 = vpack.c.bf16 %v1085_v16, %v1082_v15 }
  0x5f   : > { %2294 = vmatpush1.bf16.msra.mxu0 %v2293_v47  ;;  %4035 = vst [vmem:[#allocation7_spill] sm:$0xff] %v3319_v21  ;;  %v3321_v47 = vpack.c.bf16 %v1037_v20, %v1034_v43 }
  0x60   : > { %2296 = vmatprep.subr.bf16.mxu0 %v2295_v49  ;;  %v1088_v49 = vand.u32 4294901760, %v999_v26 }
  0x61   : > { %4036 = vst [vmem:[#allocation8_spill] sm:$0xff] %v3321_v47 }
  0x63   : > { %2298 = vmatpush1.bf16.msra.mxu0 %v2297_v62  ;;  %v1091_v62 = vand.u32 4294901760, %v1000_v30 }
  0x64   : > { %2300 = vmatprep.subr.bf16.mxu0 %v3000_v27  ;;  %v3159_v27 = vld [vmem:[%s3918_s3 + $0x18] sm:$0xff] }
  0x65   : > { %v3951_v28 = vand.u32 4294901760, %v3159_v27 }
  0x66   : > { %860 = vmatmul.mubr.f32.vlgmr.msra.gmra.mrb[0].mxu0 %v3011_v24 }
  0x67   : > { %2302 = vmatpush1.bf16.msra.mxu0 %v3008_v23  ;;  %946 = vmatprep.mubr.f32.mxu0 %v2659_v9  ;;  %v1052_v9 = vand.u32 4294901760, %v3104_v29  ;;  %v3169_v23 = vpack.c.bf16 %v3953_v58, %v3954_v53  ;;  %v3367_v58 = vsub.f32 %v3109_v63, %v1055_v36  ;;  %v4042_v63 = vand.u32 4294901760, %v3145_v35 }
  0x68   : > { %2304 = vmatprep.subr.bf16.mxu0 %v3017_v0  ;;  %v3180_v0 = vld [vmem:[%s3918_s3 + $0xa0] sm:$0xff] }
  0x69   : > { %v3129_v52 = vpack.c.bf16 %v1055_v36, %v1052_v9  ;;  %v3950_v2 = vand.u32 4294901760, %v3180_v0  ;;  %v3389_v36 = vsub.f32 %v3145_v35, %v4042_v63 }
  0x6b   : > { %2306 = vmatpush1.bf16.msra.mxu0 %v2225_v3  ;;  %2316 = vmatprep.subr.bf16.mxu1 %v3129_v52  ;;  %v3949_v3 = vand.u32 4294901760, %v3185_v1 }
  0x6c   : > { %2308 = vmatprep.subr.bf16.mxu0 %v2227_v5  ;;  %2318 = vmatpush3.bf16.msra.mxu1 %v3135_v59  ;;  %v3199_v5 = vld [vmem:[%s3918_s3 + $0x28] sm:$0xff] }
  0x6d   : > { %2320 = vmatprep.subr.bf16.mxu1 %v3169_v23  ;;  %v3947_v7 = vand.u32 4294901760, %v3199_v5  ;;  %v3209_v8 = vpack.c.bf16 %v3949_v3, %v3950_v2  ;;  %v985_v3 = vld [vmem:[%s3918_s3 + $0x70] sm:$0xff]  ;;  %v986_v2 = vld [vmem:[%s3918_s3 + $0x78] sm:$0xff] }
  0x6e   : > { %v1049_v48 = vand.u32 4294901760, %v986_v2 }
  0x6f   : > { %2310 = vmatpush1.bf16.msra.mxu0 %v2229_v11  ;;  %v3215_v10 = vpack.c.bf16 %v3947_v7, %v3948_v6  ;;  %v3220_v11 = vld [vmem:[%s3918_s3 + $0xb0] sm:$0xff] }
  0x70   : > { %2312 = vmatprep.subr.bf16.mxu0 %v2231_v14  ;;  %v3946_v13 = vand.u32 4294901760, %v3220_v11  ;;  %v3945_v14 = vand.u32 4294901760, %v3225_v12 }
  0x72   : > { %v3249_v40 = vpack.c.bf16 %v3945_v14, %v3946_v13  ;;  %v1001_v14 = vld [vmem:[%s3918_s3 + $0xf0] sm:$0xff]  ;;  %v1002_v13 = vld [vmem:[%s3918_s3 + $0xf8] sm:$0xff] }
  0x73   : > { %2314 = vmatpush1.bf16.msra.mxu0 %v2233_v45  ;;  %v3255_v45 = vpack.c.bf16 %v3943_v39, %v3944_v34  ;;  %v3339_v39 = vpack.c.bf16 %v1091_v62, %v1088_v49  ;;  %v3341_v34 = vpack.c.bf16 %v1043_v54, %v1040_v55  ;;  %v1094_v7 = vand.u32 4294901760, %v1001_v14 }
  0x74   : > { %2412 = vmatprep.subr.bf16.mxu0 %v3129_v52  ;;  %v1097_v6 = vand.u32 4294901760, %v1002_v13 }
  0x75   : > { %4037 = vst [vmem:[#allocation9_spill] sm:$0xff] %v3339_v39  ;;  %4038 = vst [vmem:[#allocation10_spill] sm:$0xff] %v3341_v34 }
  0x76   : > { %948 = vmatmul.mubr.f32.vlgmr.msra.gmra.mrb[0].mxu0 %v3011_v24  ;;  %v3175_v24 = vpack.c.bf16 %v3951_v28, %v3952_v25  ;;  %v1046_v28 = vand.u32 4294901760, %v985_v3  ;;  %v3362_v25 = vsub.f32 %v3104_v29, %v1052_v9  ;;  %v3369_v53 = vpack.c.bf16 %v1097_v6, %v1094_v7 }
  0x77   : > { %2414 = vmatpush3.bf16.msra.mxu0 %v3135_v59  ;;  %v4041_v29 = vand.u32 4294901760, %v3140_v60 }
  0x78   : > { %2416 = vmatprep.subr.bf16.mxu0 %v3169_v23  ;;  %2322 = vmatpush3.bf16.msra.mxu1 %v3175_v24  ;;  %4039 = vst [vmem:[#allocation11_spill] sm:$0xff] %v3369_v53 }
  0x79   : > { %2324 = vmatprep.subr.bf16.mxu1 %v3209_v8  ;;  %v3384_v9 = vsub.f32 %v3140_v60, %v4041_v29  ;;  %v4046_v29 = vand.u32 4294901760, %v3185_v1 }
  0x7b   : > { %2418 = vmatpush3.bf16.msra.mxu0 %v3175_v24  ;;  %v3409_v35 = vsub.f32 %v3185_v1, %v4046_v29  ;;  %v4050_v1 = vand.u32 4294901760, %v3225_v12 }
  0x7c   : > { %2420 = vmatprep.subr.bf16.mxu0 %v3209_v8  ;;  %2326 = vmatpush3.bf16.msra.mxu1 %v3215_v10 }
  0x7d   : > { %2328 = vmatprep.subr.bf16.mxu1 %v3249_v40 }
  0x7f   : > { %2422 = vmatpush3.bf16.msra.mxu0 %v3215_v10 }
  0x80   : > { %2424 = vmatprep.subr.bf16.mxu0 %v3249_v40  ;;  %2330 = vmatpush3.bf16.msra.mxu1 %v3255_v45 }
  0x81   : > { %2332 = vmatprep.subr.bf16.mxu1 %v3289_v32 }
  0x83   : > { %2426 = vmatpush3.bf16.msra.mxu0 %v3255_v45 }
  0x84   : > { %2428 = vmatprep.subr.bf16.mxu0 %v3289_v32  ;;  %2334 = vmatpush3.bf16.msra.mxu1 %v3295_v33 }
  0x85   : > { %2336 = vmatprep.subr.bf16.mxu1 %v3319_v21 }
  0x87   : > { %2430 = vmatpush3.bf16.msra.mxu0 %v3295_v33 }
  0x88   : > { %2432 = vmatprep.subr.bf16.mxu0 %v3319_v21  ;;  %2338 = vmatpush3.bf16.msra.mxu1 %v3321_v47  ;;  %v4043_v21 = vand.u32 4294901760, %v3154_v38 }
  0x89   : > { %2340 = vmatprep.subr.bf16.mxu1 %v3339_v39 }
  0x8b   : > { %2434 = vmatpush3.bf16.msra.mxu0 %v3321_v47 }
  0x8c   : > { %2436 = vmatprep.subr.bf16.mxu0 %v3339_v39  ;;  %2342 = vmatpush3.bf16.msra.mxu1 %v3341_v34  ;;  %v3374_v39 = vsub.f32 %v3116_v42, %v1004_v46  ;;  %v3394_v42 = vsub.f32 %v3154_v38, %v4043_v21  ;;  %v4044_v46 = vand.u32 4294901760, %v3159_v27  ;;  %v4047_v38 = vand.u32 4294901760, %v3194_v4 }
  0x8d   : > { %2344 = vmatprep.subr.bf16.mxu1 %v3369_v53 }
  0x8e   : > { %v3415_v21 = vsub.f32 %v3194_v4, %v4047_v38  ;;  %v4051_v4 = vand.u32 4294901760, %v3234_v18 }
  0x8f   : > { %2438 = vmatpush3.bf16.msra.mxu0 %v3341_v34  ;;  %v4040_v34 = vand.u32 4294901760, %v3121_v44 }
  0x90   : > { %2440 = vmatprep.subr.bf16.mxu0 %v3369_v53  ;;  %v3436_v29 = vsub.f32 %v3234_v18, %v4051_v4  ;;  %v4056_v4 = vand.u32 4294901760, %v3279_v57  ;;  %v3475_v53 = vsub.f32 %v1000_v30, %v1091_v62 }
  0x91   : > { %v3379_v47 = vsub.f32 %v3121_v44, %v4040_v34  ;;  %v3399_v44 = vsub.f32 %v3159_v27, %v4044_v46  ;;  %v4045_v34 = vand.u32 4294901760, %v3180_v0  ;;  %v4048_v27 = vand.u32 4294901760, %v3199_v5 }
  0x92   : > { %4059 = vst [vmem:[#allocation14_spill] sm:$0xff] %v3475_v53 }
  0x93   : > { %v3404_v60 = vsub.f32 %v3180_v0, %v4045_v34  ;;  %v3420_v63 = vsub.f32 %v3199_v5, %v4048_v27  ;;  %v4049_v0 = vand.u32 4294901760, %v3220_v11  ;;  %v3430_v34 = vsub.f32 %v3225_v12, %v4050_v1 }
  0x94   : > { %v4052_v5 = vand.u32 4294901760, %v3239_v22  ;;  %v4054_v12 = vand.u32 4294901760, %v3265_v51  ;;  %v4055_v1 = vand.u32 4294901760, %v3274_v56 }
  0x95   : > { %v3425_v46 = vsub.f32 %v3220_v11, %v4049_v0  ;;  %v4053_v11 = vand.u32 4294901760, %v3260_v50 }
  0x96   : > { %v3441_v38 = vsub.f32 %v3239_v22, %v4052_v5  ;;  %v3451_v0 = vsub.f32 %v3265_v51, %v4054_v12  ;;  %v3456_v18 = vsub.f32 %v3274_v56, %v4055_v1  ;;  %v3461_v22 = vsub.f32 %v3279_v57, %v4056_v4 }
  0x97   : > { %v3446_v27 = vsub.f32 %v3260_v50, %v4053_v11  ;;  %v3464_v5 = vsub.f32 %v3300_v37, %v1082_v15  ;;  %v3467_v50 = vsub.f32 %v3305_v41, %v1085_v16  ;;  %v3469_v11 = vsub.f32 %v981_v17, %v1034_v43 }
  0x98   : > { %v3471_v51 = vsub.f32 %v982_v19, %v1037_v20  ;;  %v3473_v12 = vsub.f32 %v999_v26, %v1088_v49  ;;  %v3477_v56 = vsub.f32 %v983_v31, %v1040_v55  ;;  %v3479_v1 = vsub.f32 %v984_v61, %v1043_v54 }
  0x99   : > { %4057 = vst [vmem:[#allocation12_spill] sm:$0xff] %v3469_v11  ;;  %v3481_v57 = vsub.f32 %v1001_v14, %v1094_v7  ;;  %v3483_v4 = vsub.f32 %v1002_v13, %v1097_v6  ;;  %v3485_v37 = vpack.c.bf16 %v1049_v48, %v1046_v28  ;;  %v3487_v41 = vsub.f32 %v985_v3, %v1046_v28 }
  0x9a   : > { %4058 = vst [vmem:[#allocation13_spill] sm:$0xff] %v3473_v12  ;;  %4060 = vst [vmem:[#allocation15_spill] sm:$0xff] %v3477_v56  ;;  %v3489_v15 = vsub.f32 %v986_v2, %v1049_v48  ;;  %v3967_v16 = vand.u32 4294901760, %v3362_v25  ;;  %v3964_v17 = vand.u32 4294901760, %v3367_v58  ;;  %v3963_v19 = vand.u32 4294901760, %v3374_v39 }
  0x9b   : > { %4061 = vst [vmem:[#allocation16_spill] sm:$0xff] %v3479_v1  ;;  %4062 = vst [vmem:[#allocation17_spill] sm:$0xff] %v3481_v57  ;;  %v3961_v55 = vand.u32 4294901760, %v3379_v47  ;;  %v3962_v54 = vand.u32 4294901760, %v3384_v9  ;;  %2442 = vmatpush3.bf16.msra.mxu0 %v3485_v37  ;;  %2346 = vmatpush3.bf16.msra.mxu1 %v3485_v37  ;;  %v3965_v48 = vand.u32 4294901760, %v3389_v36  ;;  %v3966_v2 = vand.u32 4294901760, %v3394_v42 }
  0x9c   : > { %4063 = vst [vmem:[#allocation18_spill] sm:$0xff] %v3483_v4  ;;  %4064 = vst [vmem:[#allocation19_spill] sm:$0xff] %v3485_v37  ;;  %v1231_v28 = vsub.f32 %v3362_v25, %v3967_v16  ;;  %v3969_v3 = vand.u32 4294901760, %v3399_v44  ;;  %2476 = vmatprep.subr.bf16.mxu0 %v3129_v52  ;;  %v1238_v6 = vsub.f32 %v3367_v58, %v3964_v17  ;;  %v3986_v33 = vand.u32 4294901760, %v3473_v12 }
  0x9d   : > { %4065 = vst [vmem:[#allocation20_spill] sm:$0xff] %v3487_v41  ;;  %4066 = vst [vmem:[#allocation21_spill] sm:$0xff] %v3489_v15  ;;  %v1119_v7 = vsub.f32 %v3374_v39, %v3963_v19  ;;  %v1126_v13 = vsub.f32 %v3379_v47, %v3961_v55  ;;  %v1245_v14 = vsub.f32 %v3384_v9, %v3962_v54 }
  0x9e   : > { %v1232_v61 = vand.u32 4294901760, %v1231_v28  ;;  %v1252_v52 = vsub.f32 %v3389_v36, %v3965_v48  ;;  %v1133_v31 = vsub.f32 %v3394_v42, %v3966_v2  ;;  %v1140_v43 = vsub.f32 %v3399_v44, %v3969_v3 }
  0x9f   : > { %v1239_v20 = vand.u32 4294901760, %v1238_v6  ;;  %v1120_v26 = vand.u32 4294901760, %v1119_v7  ;;  %v1127_v30 = vand.u32 4294901760, %v1126_v13  ;;  %v1246_v49 = vand.u32 4294901760, %v1245_v14 }
  0xa0   : > { %v1253_v62 = vand.u32 4294901760, %v1252_v52  ;;  %v1134_v55 = vand.u32 4294901760, %v1133_v31  ;;  %v1141_v54 = vand.u32 4294901760, %v1140_v43  ;;  %v3981_v28 = vand.u32 4294901760, %v3404_v60 }
  0xa1   : > { %v2347_v19 = vpack.c.bf16 %v1239_v20, %v1232_v61  ;;  %v3527_v17 = vpack.c.bf16 %v1127_v30, %v1120_v26  ;;  %v3975_v48 = vand.u32 4294901760, %v3409_v35  ;;  %v3972_v2 = vand.u32 4294901760, %v3415_v21 }
  0xa2   : > { %v3531_v16 = vpack.c.bf16 %v1253_v62, %v1246_v49  ;;  %v3533_v37 = vpack.c.bf16 %v1141_v54, %v1134_v55  ;;  %v1259_v6 = vsub.f32 %v3404_v60, %v3981_v28  ;;  %v3970_v7 = vand.u32 4294901760, %v3420_v63 }
  0xa3   : > { %2348 = vmatprep.subr.bf16.mxu1 %v2347_v19  ;;  %v1266_v13 = vsub.f32 %v3409_v35, %v3975_v48  ;;  %v1147_v14 = vsub.f32 %v3415_v21, %v3972_v2  ;;  %v3971_v61 = vand.u32 4294901760, %v3425_v46  ;;  %v3973_v55 = vand.u32 4294901760, %v3430_v34 }
  0xa4   : > { %v1260_v54 = vand.u32 4294901760, %v1259_v6  ;;  %v1154_v52 = vsub.f32 %v3420_v63, %v3970_v7  ;;  %v3974_v31 = vand.u32 4294901760, %v3436_v29  ;;  %v3976_v19 = vand.u32 4294901760, %v3441_v38 }
  0xa5   : > { %v1267_v43 = vand.u32 4294901760, %v1266_v13  ;;  %v1148_v20 = vand.u32 4294901760, %v1147_v14  ;;  %v1273_v26 = vsub.f32 %v3425_v46, %v3971_v61  ;;  %v1280_v30 = vsub.f32 %v3430_v34, %v3973_v55 }
  0xa6   : > { %v1155_v49 = vand.u32 4294901760, %v1154_v52  ;;  %v1161_v62 = vsub.f32 %v3436_v29, %v3974_v31  ;;  %v1168_v6 = vsub.f32 %v3441_v38, %v3976_v19  ;;  %v3978_v13 = vand.u32 4294901760, %v3446_v27 }
  0xa7   : > { %v3565_v14 = vpack.c.bf16 %v1267_v43, %v1260_v54  ;;  %v1274_v3 = vand.u32 4294901760, %v1273_v26  ;;  %v1281_v7 = vand.u32 4294901760, %v1280_v30  ;;  %v3977_v61 = vand.u32 4294901760, %v3451_v0 }
  0xa8   : > { %v3568_v2 = vpack.c.bf16 %v1155_v49, %v1148_v20  ;;  %v1162_v55 = vand.u32 4294901760, %v1161_v62  ;;  %v1169_v52 = vand.u32 4294901760, %v1168_v6  ;;  %v1287_v31 = vsub.f32 %v3446_v27, %v3978_v13 }
  0xa9   : > { %v3573_v48 = vpack.c.bf16 %v1281_v7, %v1274_v3  ;;  %v1294_v19 = vsub.f32 %v3451_v0, %v3977_v61  ;;  %v3980_v54 = vand.u32 4294901760, %v3456_v18  ;;  %v3979_v43 = vand.u32 4294901760, %v3461_v22 }
  0xaa   : > { %v3580_v26 = vpack.c.bf16 %v1169_v52, %v1162_v55  ;;  %v1288_v20 = vand.u32 4294901760, %v1287_v31  ;;  %v3982_v30 = vand.u32 4294901760, %v3464_v5  ;;  %v3984_v49 = vand.u32 4294901760, %v3467_v50 }
  0xab   : > { %v1295_v62 = vand.u32 4294901760, %v1294_v19  ;;  %v1175_v3 = vsub.f32 %v3456_v18, %v3980_v54  ;;  %v1182_v7 = vsub.f32 %v3461_v22, %v3979_v43  ;;  %v3987_v6 = vand.u32 4294901760, %v3469_v11 }
  0xac   : > { %4067 = vst [vmem:[#allocation22_spill] sm:$0xff] %v3580_v26  ;;  %v1301_v55 = vsub.f32 %v3464_v5, %v3982_v30  ;;  %v1308_v31 = vsub.f32 %v3467_v50, %v3984_v49  ;;  %v3985_v19 = vand.u32 4294901760, %v3471_v51 }
  0xad   : > { %v3598_v52 = vpack.c.bf16 %v1295_v62, %v1288_v20  ;;  %v1176_v61 = vand.u32 4294901760, %v1175_v3  ;;  %v1183_v13 = vand.u32 4294901760, %v1182_v7  ;;  %v1189_v43 = vsub.f32 %v3469_v11, %v3987_v6 }
  0xae   : > { %v1302_v54 = vand.u32 4294901760, %v1301_v55  ;;  %v1309_v28 = vand.u32 4294901760, %v1308_v31  ;;  %v1196_v30 = vsub.f32 %v3471_v51, %v3985_v19  ;;  %v3988_v20 = vand.u32 4294901760, %v3475_v53 }
  0xaf   : > { %4068 = vst [vmem:[#allocation23_spill] sm:$0xff] %v3598_v52  ;;  %v3607_v26 = vpack.c.bf16 %v1183_v13, %v1176_v61  ;;  %v1190_v49 = vand.u32 4294901760, %v1189_v43  ;;  %v3989_v62 = vand.u32 4294901760, %v3477_v56  ;;  %v1315_v55 = vsub.f32 %v3473_v12, %v3986_v33 }
  0xb0   : > { %v3611_v3 = vpack.c.bf16 %v1309_v28, %v1302_v54  ;;  %v1197_v7 = vand.u32 4294901760, %v1196_v30  ;;  %v3990_v31 = vand.u32 4294901760, %v3479_v1  ;;  %v1322_v19 = vsub.f32 %v3475_v53, %v3988_v20 }
  0xb1   : > { %4069 = vst [vmem:[#allocation24_spill] sm:$0xff] %v3607_v26  ;;  %v1203_v61 = vsub.f32 %v3477_v56, %v3989_v62  ;;  %v3991_v13 = vand.u32 4294901760, %v3481_v57  ;;  %v3992_v28 = vand.u32 4294901760, %v3483_v4  ;;  %v1316_v43 = vand.u32 4294901760, %v1315_v55 }
  0xb2   : > { %4070 = vst [vmem:[#allocation25_spill] sm:$0xff] %v3611_v3  ;;  %v3625_v54 = vpack.c.bf16 %v1197_v7, %v1190_v49  ;;  %v1210_v30 = vsub.f32 %v3479_v1, %v3990_v31  ;;  %v3993_v33 = vand.u32 4294901760, %v3487_v41  ;;  %v1323_v6 = vand.u32 4294901760, %v1322_v19 }
  0xb3   : > { %v1204_v3 = vand.u32 4294901760, %v1203_v61  ;;  %v1329_v20 = vsub.f32 %v3481_v57, %v3991_v13  ;;  %v1336_v62 = vsub.f32 %v3483_v4, %v3992_v28  ;;  %v3994_v7 = vand.u32 4294901760, %v3489_v15 }
  0xb4   : > { %4071 = vst [vmem:[#allocation26_spill] sm:$0xff] %v3625_v54  ;;  %v1211_v26 = vand.u32 4294901760, %v1210_v30  ;;  %v1217_v49 = vsub.f32 %v3487_v41, %v3993_v33  ;;  %v3641_v55 = vpack.c.bf16 %v1323_v6, %v1316_v43  ;;  %v4082_v6 = vand.u32 4294901760, %v3420_v63 }
  0xb5   : > { %v1330_v31 = vand.u32 4294901760, %v1329_v20  ;;  %v1337_v19 = vand.u32 4294901760, %v1336_v62  ;;  %v1224_v13 = vsub.f32 %v3489_v15, %v3994_v7  ;;  %v4075_v7 = vand.u32 4294901760, %v3374_v39 }
  0xb6   : > { %v3643_v61 = vpack.c.bf16 %v1211_v26, %v1204_v3  ;;  %v1218_v54 = vand.u32 4294901760, %v1217_v49  ;;  %v4073_v3 = vand.u32 4294901760, %v3367_v58  ;;  %v4076_v20 = vand.u32 4294901760, %v3379_v47 }
  0xb7   : > { %v3648_v52 = vpack.c.bf16 %v1337_v19, %v1330_v31  ;;  %v1225_v30 = vand.u32 4294901760, %v1224_v13  ;;  %v4072_v19 = vand.u32 4294901760, %v3362_v25  ;;  %v4079_v26 = vand.u32 4294901760, %v3409_v35 }
  0xb8   : > { %v3694_v13 = vpack.c.bf16 %v4076_v20, %v4075_v7  ;;  %v4081_v49 = vand.u32 4294901760, %v3415_v21  ;;  %v4085_v41 = vand.u32 4294901760, %v3461_v22 }
  0xb9   : > { %v3650_v28 = vpack.c.bf16 %v1225_v30, %v1218_v54  ;;  %v3688_v30 = vpack.c.bf16 %v4073_v3, %v4072_v19  ;;  %v4078_v54 = vand.u32 4294901760, %v3404_v60  ;;  %v293_v3 = vlaneseq }
  0xba   : > { %4077 = vst [vmem:[#allocation28_spill] sm:$0xff] %v3694_v13  ;;  %v3706_v33 = vpack.c.bf16 %v4082_v6, %v4081_v49 }
  0xbb   : > { %4074 = vst [vmem:[#allocation27_spill] sm:$0xff] %v3688_v30  ;;  %v3700_v43 = vpack.c.bf16 %v4079_v26, %v4078_v54  ;;  %v294_v19 = vshrl.u32 %v293_v3, 7  ;;  %v4084_v30 = vand.u32 4294901760, %v3456_v18  ;;  %v291_v26 = vld [vmem:[%s3917_s2] sm:$0x3] }
  0xbc   : > { %4083 = vst [vmem:[#allocation30_spill] sm:$0xff] %v3706_v33 }
  0xbd   : > { %4080 = vst [vmem:[#allocation29_spill] sm:$0xff] %v3700_v43  ;;  %v3712_v7 = vpack.c.bf16 %v4085_v41, %v4084_v30  ;;  %v295_v20 = vsub.s32 0, %v294_v19  ;;  %v299_v54 = vsub.s32 1, %v294_v19 }
  0xbf   : > { %4086 = vst [vmem:[#allocation31_spill] sm:$0xff] %v3712_v7  ;;  %v296_v43 = vrot.slane %v291_v26, %v295_v20  ;;  %v300_v13 = vrot.slane %v291_v26, %v299_v54  ;;  %v4113_v54 = vld [vmem:[#allocation13_spill] sm:$0xff] }
 0x112   : > { %v394_v62 = vpop.f32.mrb[0].mxu1 }
 0x113   : > { %v396_v31 = vpop.f32.mrb[1].mxu1  ;;  %v395_v15 = vadd.f32 %v394_v62, %v296_v43 }
 0x114   : > { %v397_v57 = vadd.f32 %v396_v31, %v300_v13 }
 0x149   : > { %v949_v6 = vpop.f32.mrb[0].mxu0 }
 0x14a   : > { %v2508_v49 = vadd.f32 %v949_v6, %v395_v15  ;;  %v951_v33 = vpop.f32.mrb[1].mxu0 }
 0x14b   : > { %v2510_v3 = vadd.f32 %v951_v33, %v397_v57 }
 0x14c   : > { %v954_v4 = vmul.f32 %v2508_v49, %v2508_v49  ;;  %v964_v11 = vmul.f32 0.5, %v2508_v49 }
 0x14d   : > { %v955_v56 = vmul.f32 %v2510_v3, %v2510_v3  ;;  %v965_v20 = vmul.f32 0.5, %v2510_v3 }
 0x14e   : > { %v956_v1 = vmul.f32 0.035677407, %v954_v4 }
 0x14f   : > { %v957_v12 = vmul.f32 0.035677407, %v955_v56 }
 0x150   : > { %v958_v41 = vadd.f32 0.7978846, %v956_v1 }
 0x151   : > { %v959_v30 = vadd.f32 0.7978846, %v957_v12 }
 0x152   : > { %v960_v7 = vmul.f32 %v2508_v49, %v958_v41  ;;  %v4115_v49 = vld [vmem:[#allocation16_spill] sm:$0xff] }
 0x153   : > { %v961_v53 = vmul.f32 %v2510_v3, %v959_v30  ;;  %v4116_v3 = vld [vmem:[#allocation15_spill] sm:$0xff]  ;;  %v4118_v30 = vld [vmem:[#allocation18_spill] sm:$0xff] }
 0x154   : > { %2575 = vtanh.f32 %v960_v7  ;;  %v4117_v41 = vpack.c.bf16 %v4115_v49, %v4116_v3 }
 0x155   : > { %2577 = vtanh.f32 %v961_v53 }
 0x15e   : > { %v2576_v19 = vpop.eup %2575 }
 0x15f   : > { %v2578_v26 = vpop.eup %2577  ;;  %v966_v62 = vmul.f32 %v2576_v19, %v964_v11  ;;  %v4119_v19 = vld [vmem:[#allocation17_spill] sm:$0xff] }
 0x160   : > { %v967_v31 = vmul.f32 %v2578_v26, %v965_v20 }
 0x161   : > { %v968_v13 = vadd.f32 %v966_v62, %v964_v11  ;;  %v4124_v62 = vld [vmem:[#allocation27_spill] sm:$0xff] }
 0x162   : > { %v969_v15 = vadd.f32 %v967_v31, %v965_v20  ;;  %v4122_v20 = vld [vmem:[#allocation20_spill] sm:$0xff]  ;;  %v4125_v31 = vand.u32 4294901760, %v3384_v9 }
 0x163   : > { %v3717_v43 = vand.u32 4294901760, %v968_v13 }
 0x164   : > { %v3719_v33 = vand.u32 4294901760, %v969_v15 }
 0x165   : > { %v3722_v56 = vsub.f32 %v968_v13, %v3717_v43  ;;  %v4126_v13 = vand.u32 4294901760, %v3389_v36 }
 0x166   : > { %v1100_v12 = vsub.f32 %v969_v15, %v3719_v33 }
 0x167   : > { %v1107_v1 = vand.u32 4294901760, %v3722_v56  ;;  %v2447_v15 = vpack.c.bf16 %v4126_v13, %v4125_v31 }
 0x168   : > { %v1101_v53 = vand.u32 4294901760, %v1100_v12 }
 0x169   : > { %v1108_v57 = vsub.f32 %v3722_v56, %v1107_v1 }
 0x16a   : > { %1584 = vmatprep.mubr.f32.mxu0 %v1101_v53  ;;  %v1102_v4 = vsub.f32 %v1100_v12, %v1101_v53  ;;  %v4129_v53 = vand.u32 4294901760, %v3399_v44 }
 0x16b   : > { %1588 = vmatmul.mubr.f32.vlgmr.msra.gmra.mrb[2].mxu0 %v1107_v1  ;;  %v1109_v7 = vand.u32 4294901760, %v1108_v57  ;;  %v4128_v1 = vand.u32 4294901760, %v3394_v42 }
 0x16c   : > { %2478 = vmatpush3.bf16.msra.mxu0 %v3135_v59  ;;  %1858 = vmatprep.mubr.f32.mxu0 %v3719_v33  ;;  %v1103_v11 = vand.u32 4294901760, %v1102_v4  ;;  %v4087_v59 = vld [vmem:[#allocation22_spill] sm:$0xff]  ;;  %v4130_v4 = vld [vmem:[#allocation29_spill] sm:$0xff] }
 0x16d   : > { %2480 = vmatprep.subr.bf16.mxu0 %v3169_v23  ;;  %v4088_v23 = vld [vmem:[#allocation6_spill] sm:$0xff]  ;;  %v2449_v57 = vpack.c.bf16 %v4129_v53, %v4128_v1 }
 0x16e   : > { %1104 = vmatprep.mubr.f32.mxu1 %v1103_v11 }
 0x16f   : > { %1110 = vmatmul.mubr.f32.vlgmr.msra.gmra.mrb[2].mxu1 %v1109_v7  ;;  %v4133_v7 = vld [vmem:[#allocation30_spill] sm:$0xff] }
 0x170   : > { %2350 = vmatpush3.bf16.msra.mxu1 %v3527_v17  ;;  %2482 = vmatpush3.bf16.msra.mxu0 %v3175_v24  ;;  %v4089_v24 = vld [vmem:[#allocation23_spill] sm:$0xff]  ;;  %v4096_v17 = vld [vmem:[#allocation10_spill] sm:$0xff] }
 0x171   : > { %1340 = vmatprep.mubr.f32.mxu1 %v3719_v33  ;;  %2352 = vmatprep.subr.bf16.mxu1 %v3531_v16  ;;  %v4094_v16 = vld [vmem:[#allocation9_spill] sm:$0xff] }
 0x172   : > { %2484 = vmatprep.subr.bf16.mxu0 %v3209_v8  ;;  %v4090_v8 = vld [vmem:[#allocation7_spill] sm:$0xff] }
 0x174   : > { %2354 = vmatpush3.bf16.msra.mxu1 %v3533_v37  ;;  %2486 = vmatpush3.bf16.msra.mxu0 %v3215_v10  ;;  %v4091_v10 = vld [vmem:[#allocation24_spill] sm:$0xff] }
 0x175   : > { %2356 = vmatprep.subr.bf16.mxu1 %v3565_v14  ;;  %2488 = vmatprep.subr.bf16.mxu0 %v3249_v40  ;;  %v4092_v37 = vld [vmem:[#allocation8_spill] sm:$0xff]  ;;  %v4093_v40 = vld [vmem:[#allocation25_spill] sm:$0xff]  ;;  %v4100_v14 = vpack.c.bf16 %v3379_v47, %v3374_v39  ;;  %v4106_v39 = vpack.c.bf16 %v3441_v38, %v3436_v29  ;;  %v4107_v47 = vpack.c.bf16 %v3451_v0, %v3446_v27 }
 0x178   : > { %2358 = vmatpush3.bf16.msra.mxu1 %v3568_v2  ;;  %2490 = vmatpush3.bf16.msra.mxu0 %v3255_v45  ;;  %v4095_v45 = vld [vmem:[#allocation26_spill] sm:$0xff]  ;;  %v4099_v2 = vpack.c.bf16 %v3367_v58, %v3362_v25  ;;  %v4104_v58 = vpack.c.bf16 %v3420_v63, %v3415_v21  ;;  %v4105_v25 = vpack.c.bf16 %v3430_v34, %v3425_v46  ;;  %v4110_v21 = vld [vmem:[#allocation12_spill] sm:$0xff] }
 0x179   : > { %2360 = vmatprep.subr.bf16.mxu1 %v3573_v48  ;;  %2492 = vmatprep.subr.bf16.mxu0 %v3289_v32  ;;  %v4097_v32 = vld [vmem:[#allocation11_spill] sm:$0xff]  ;;  %v4111_v63 = vpack.c.bf16 %v3471_v51, %v4110_v21 }
 0x17a   : > { %v4098_v48 = vld [vmem:[#allocation19_spill] sm:$0xff] }
 0x17c   : > { %2362 = vmatpush3.bf16.msra.mxu1 %v4087_v59  ;;  %2494 = vmatpush3.bf16.msra.mxu0 %v4088_v23 }
 0x17d   : > { %2364 = vmatprep.subr.bf16.mxu1 %v4089_v24  ;;  %2496 = vmatprep.subr.bf16.mxu0 %v4090_v8  ;;  %v4140_v8 = vld [vmem:[#allocation31_spill] sm:$0xff] }
 0x180   : > { %2366 = vmatpush3.bf16.msra.mxu1 %v4091_v10  ;;  %2498 = vmatpush3.bf16.msra.mxu0 %v4092_v37 }
 0x181   : > { %2368 = vmatprep.subr.bf16.mxu1 %v4093_v40  ;;  %2500 = vmatprep.subr.bf16.mxu0 %v4094_v16  ;;  %v4145_v40 = vand.u32 4294901760, %v4116_v3  ;;  %v4147_v16 = vand.u32 4294901760, %v4119_v19 }
 0x184   : > { %2370 = vmatpush3.bf16.msra.mxu1 %v4095_v45  ;;  %2502 = vmatpush3.bf16.msra.mxu0 %v4096_v17  ;;  %v4148_v45 = vand.u32 4294901760, %v4118_v30 }
 0x185   : > { %2372 = vmatprep.subr.bf16.mxu1 %v3641_v55  ;;  %2504 = vmatprep.subr.bf16.mxu0 %v4097_v32  ;;  %v4101_v55 = vpack.c.bf16 %v3389_v36, %v3384_v9  ;;  %v4131_v9 = vand.u32 4294901760, %v3425_v46  ;;  %v4132_v36 = vand.u32 4294901760, %v3430_v34  ;;  %v4138_v46 = vand.u32 4294901760, %v3464_v5 }
 0x186   : > { %v4139_v34 = vand.u32 4294901760, %v3467_v50  ;;  %v2471_v17 = vpack.c.bf16 %v4148_v45, %v4147_v16 }
 0x187   : > { %v2455_v11 = vpack.c.bf16 %v4132_v36, %v4131_v9 }
 0x188   : > { %2374 = vmatpush3.bf16.msra.mxu1 %v3643_v61  ;;  %2506 = vmatpush3.bf16.msra.mxu0 %v4098_v48  ;;  %v4112_v61 = vld [vmem:[#allocation14_spill] sm:$0xff]  ;;  %v2463_v24 = vpack.c.bf16 %v4139_v34, %v4138_v46 }
 0x189   : > { %2376 = vmatprep.subr.bf16.mxu1 %v3648_v52  ;;  %v4102_v52 = vpack.c.bf16 %v3399_v44, %v3394_v42  ;;  %v4114_v6 = vpack.c.bf16 %v4112_v61, %v4113_v54  ;;  %v4136_v42 = vand.u32 4294901760, %v3446_v27  ;;  %v4137_v44 = vand.u32 4294901760, %v3451_v0 }
 0x18a   : > { %v4143_v27 = vand.u32 4294901760, %v4113_v54  ;;  %v4144_v0 = vand.u32 4294901760, %v4112_v61 }
 0x18b   : > { %1860 = vmatmul.mubr.f32.vlgmr.msra.gmra.mrb[4].mxu0 %v3717_v43  ;;  %v2459_v23 = vpack.c.bf16 %v4137_v44, %v4136_v42 }
 0x18c   : > { %2378 = vmatpush3.bf16.msra.mxu1 %v3650_v28  ;;  %v4103_v28 = vpack.c.bf16 %v3409_v35, %v3404_v60  ;;  %v4108_v60 = vpack.c.bf16 %v3461_v22, %v3456_v18  ;;  %v4109_v35 = vpack.c.bf16 %v3467_v50, %v3464_v5  ;;  %v4120_v18 = vpack.c.bf16 %v4118_v30, %v4119_v19  ;;  %v4121_v22 = vld [vmem:[#allocation21_spill] sm:$0xff] }
 0x18d   : > { %2380 = vmatprep.subr.bf16.mxu1 %v4099_v2  ;;  %v4123_v26 = vpack.c.bf16 %v4121_v22, %v4122_v20  ;;  %v2467_v37 = vpack.c.bf16 %v4144_v0, %v4143_v27  ;;  %v4146_v5 = vand.u32 4294901760, %v4115_v49  ;;  %v4150_v32 = vand.u32 4294901760, %v4121_v22 }
 0x18f   : > { %1342 = vmatmul.mubr.f32.vlgmr.msra.gmra.mrb[4].mxu1 %v3717_v43  ;;  %v2469_v50 = vpack.c.bf16 %v4146_v5, %v4145_v40 }
 0x190   : > { %2382 = vmatpush3.bf16.msra.mxu1 %v4100_v14  ;;  %1477 = vmatprep.mubr.f32.mxu1 %v1100_v12  ;;  %v4127_v12 = vld [vmem:[#allocation28_spill] sm:$0xff] }
 0x191   : > { %2384 = vmatprep.subr.bf16.mxu1 %v4101_v55 }
 0x194   : > { %2386 = vmatpush3.bf16.msra.mxu1 %v4102_v52 }
 0x195   : > { %2388 = vmatprep.subr.bf16.mxu1 %v4103_v28 }
 0x198   : > { %2390 = vmatpush3.bf16.msra.mxu1 %v4104_v58 }
 0x199   : > { %2392 = vmatprep.subr.bf16.mxu1 %v4105_v25 }
 0x19c   : > { %2394 = vmatpush3.bf16.msra.mxu1 %v4106_v39 }
 0x19d   : > { %2396 = vmatprep.subr.bf16.mxu1 %v4107_v47 }
 0x1a0   : > { %2398 = vmatpush3.bf16.msra.mxu1 %v4108_v60 }
 0x1a1   : > { %2400 = vmatprep.subr.bf16.mxu1 %v4109_v35 }
 0x1a4   : > { %2402 = vmatpush3.bf16.msra.mxu1 %v4111_v63 }
 0x1a5   : > { %2404 = vmatprep.subr.bf16.mxu1 %v4114_v6 }
 0x1a8   : > { %2406 = vmatpush3.bf16.msra.mxu1 %v4117_v41 }
 0x1a9   : > { %2408 = vmatprep.subr.bf16.mxu1 %v4120_v18  ;;  %v970_v18 = vld [vmem:[#allocation2] sm:$0xff] }
 0x1ac   : > { %2410 = vmatpush3.bf16.msra.mxu1 %v4123_v26 }
 0x1ad   : > { %2444 = vmatprep.subr.bf16.mxu1 %v4124_v62 }
 0x1af   : > { %1480 = vmatmul.mubr.f32.vlgmr.msra.gmra.mrb[6].mxu1 %v3722_v56  ;;  %v4134_v56 = vand.u32 4294901760, %v3436_v29  ;;  %v4141_v29 = vand.u32 4294901760, %v4110_v21 }
 0x1b0   : > { %2446 = vmatpush3.bf16.msra.mxu1 %v4127_v12  ;;  %1754 = vmatprep.mubr.f32.mxu1 %v3719_v33  ;;  %v4135_v33 = vand.u32 4294901760, %v3441_v38  ;;  %v4142_v38 = vand.u32 4294901760, %v3471_v51  ;;  %v4149_v51 = vand.u32 4294901760, %v4122_v20 }
 0x1b1   : > { %2448 = vmatprep.subr.bf16.mxu1 %v2447_v15 }
 0x1b2   : > { %v2457_v59 = vpack.c.bf16 %v4135_v33, %v4134_v56  ;;  %v2465_v10 = vpack.c.bf16 %v4142_v38, %v4141_v29  ;;  %v2473_v48 = vpack.c.bf16 %v4150_v32, %v4149_v51 }
 0x1b4   : > { %2450 = vmatpush3.bf16.msra.mxu1 %v2449_v57 }
 0x1b5   : > { %2452 = vmatprep.subr.bf16.mxu1 %v4130_v4 }
 0x1b8   : > { %2454 = vmatpush3.bf16.msra.mxu1 %v4133_v7 }
 0x1b9   : > { %2456 = vmatprep.subr.bf16.mxu1 %v2455_v11 }
 0x1bc   : > { %2458 = vmatpush3.bf16.msra.mxu1 %v2457_v59 }
 0x1bd   : > { %2460 = vmatprep.subr.bf16.mxu1 %v2459_v23 }
 0x1c0   : > { %2462 = vmatpush3.bf16.msra.mxu1 %v4140_v8 }
 0x1c1   : > { %2464 = vmatprep.subr.bf16.mxu1 %v2463_v24 }
 0x1c4   : > { %2466 = vmatpush3.bf16.msra.mxu1 %v2465_v10 }
 0x1c5   : > { %2468 = vmatprep.subr.bf16.mxu1 %v2467_v37 }
 0x1c8   : > { %2470 = vmatpush3.bf16.msra.mxu1 %v2469_v50 }
 0x1c9   : > { %2472 = vmatprep.subr.bf16.mxu1 %v2471_v17 }
 0x1cc   : > { %2474 = vmatpush3.bf16.msra.mxu1 %v2473_v48 }
 0x1cf   : > { %1756 = vmatmul.mubr.f32.vlgmr.msra.gmra.mrb[8].mxu1 %v3717_v43 }
 0x23e   : > { %v2146_v2 = vpop.f32.mrb[2].mxu0 }
 0x23f   : > { %v2147_v14 = vpop.f32.mrb[3].mxu0 }
 0x240   : > { %v2148_v55 = vadd.f32 %v2147_v14, %v2146_v2 }
 0x242   : > { %v2041_v52 = vpop.f32.mrb[2].mxu1 }
 0x243   : > { %v2042_v28 = vpop.f32.mrb[3].mxu1 }
 0x244   : > { %v2043_v58 = vadd.f32 %v2042_v28, %v2041_v52 }
 0x25e   : > { %v2216_v25 = vpop.f32.mrb[4].mxu0 }
 0x25f   : > { %v2217_v39 = vpop.f32.mrb[5].mxu0 }
 0x260   : > { %v2218_v47 = vadd.f32 %v2217_v39, %v2216_v25 }
 0x262   : > { %v2076_v60 = vpop.f32.mrb[4].mxu1 }
 0x263   : > { %v2077_v35 = vpop.f32.mrb[5].mxu1 }
 0x264   : > { %v2078_v21 = vadd.f32 %v2077_v35, %v2076_v60 }
 0x266   : > { %v1344_v63 = vadd.f32 %v2078_v21, %v2043_v58 }
 0x282   : > { %v2111_v61 = vpop.f32.mrb[6].mxu1 }
 0x283   : > { %v2112_v54 = vpop.f32.mrb[7].mxu1 }
 0x284   : > { %v2113_v6 = vadd.f32 %v2112_v54, %v2111_v61 }
 0x286   : > { %v1482_v49 = vadd.f32 %v2113_v6, %v1344_v63 }
 0x288   : > { %v1590_v43 = vadd.f32 %v2148_v55, %v1482_v49 }
 0x2a2   : > { %v2181_v3 = vpop.f32.mrb[8].mxu1 }
 0x2a3   : > { %v2182_v41 = vpop.f32.mrb[9].mxu1 }
 0x2a4   : > { %v2183_v30 = vadd.f32 %v2182_v41, %v2181_v3 }
 0x2a6   : > { %v1758_v19 = vadd.f32 %v2183_v30, %v1590_v43 }
 0x2a8   : > { %v1862_v22 = vadd.f32 %v2218_v47, %v1758_v19 }
 0x2aa   : > { %v1865_v20 = vadd.f32 %v1862_v22, %v970_v18 }
 0x2ac   : > { %1866 = vst.msk [vmem:[#allocation2] sm:$0xff] %vm272_vm0, %v1865_v20 }
 0x2b3   : > { %v1870_v26 = vld [vmem:[#allocation2] sm:$0xff] }
 0x2b4   : > { %1871 = vst.msk [vmem:[%s246_s13] sm:$0xff] %vm272_vm0, %v1870_v26 }
 0x2b5   : > { %2592 = shalt.err (!%p2589_p5)
}
 0x2b6   : > { %s2593_s6 = scalar_lea.hbm %s3867_s24, 128  ;;  %s2597_s9 = scalar_lea.hbm %s3919_s4, 256 }
 0x2b7   : > { %p2594_p6 = scmp.ne.s32.totalorder %s3867_s24, %s2593_s6  ;;  %p2598_p10 = scmp.lt.u32.totalorder %s3867_s24, %s3919_s4 }
 0x2b8   : > { %p2599_p11 = scmp.lt.u32.totalorder %s2597_s9, %s2593_s6  ;;  %p2601_p13 = scmp.lt.u32.totalorder %s2593_s6, %s3867_s24 }
 0x2b9   : > { %p2595_p7 = pnand %p2594_p6, %p2726_p4 }
 0x2ba   : > { %p2600_p12 = por %p2599_p11, %p2598_p10 }
 0x2bb   : > { %p2596_p9 = pneg %p2595_p7 }
 0x2bc   : > { %p2602_p0 = por %p2601_p13, %p2600_p12 }
 0x2be   : > { %p2603_p1 = pnand %p2602_p0, %p2596_p9 }
 0x2c0   : > { %2606 = shalt.err (!%p2603_p1)
}
 0x2c1   : > { %2519 = dma.vmem_to_hbm [thread:$0]  (%p2726_p4), %s3869_s14, 128, %s3867_s24, %s1873_s26  }
 0x2c2 PF: > { %p2525_p2 = scmp.ge.s32.totalorder %s2657_s20, 2  ;;  %s1898_s12 = sand.u32 1, %s2637_s15  }
 0x2c3   : > { %s1899_s13 = scalar_lea.sflag [#allocation4], %s1898_s12 }
 0x2c4   : > { %p2522_p3 = pnand %p2525_p2, %p2733_p8 }
 0x2c6   : > { %2632 = dma.done.wait (!%p2522_p3), %s1899_s13, 128  }
 0x2c7   : > { %2634 = vsyncadd (!%p2522_p3), %s1899_s13, 4294967168  ;;  %s17_s20 = sadd.s32 1, %s2657_s20   ;;  %s4151_s15 = smov %s2641_s16 }
 0x2c8   : > { %p14_p5 = scmp.ge.s32.totalorder %s17_s20, 4   ;;  %s4152_s16 = smov %s2645_s17 }
 0x2c9   : > { %s4153_s17 = smov %s2739_s28  ;;  %s4154_s18 = smov %s2653_s19 }
 0x2ca   : > { %s4155_s19 = smov %s4157_s23  ;;  %16 = sbr.rel (!%p14_p5) target bundleno = 4 (0x4), region = 88 }
 0x2d1   :  { %1904 = vsyncpa [#allocation4], 1 }
 0x2d2   :  { %1906 = vsyncpa [#allocation4 + $0x1], 1 }

</bundles_post_ra>
